<compile_context>
chip_gen: v5e
topology: v5e:2x2
jax: 0.10.0
libtpu: 0.0.40
codegen_flags: <defaults>
</compile_context>

<pallas_src>
import functools

import jax
import jax.numpy as jnp
from jax.experimental import pallas as pl
from jax.experimental.pallas import tpu as pltpu


# ---------------------------------------------------------------------------
# Kernel 1: fused Q/K/V projection  q = x @ (Wq^T * dk), k = x @ Wk^T, v = ...
# ---------------------------------------------------------------------------
def _qkv_proj_kernel(x_ref, w_ref, q_ref, k_ref, v_ref):
    dp = q_ref.shape[-1]
    x = x_ref[...]                                   # (B, Ts, Dp) compute dtype
    qkv = jnp.einsum('bsd,de->bse', x, w_ref[...],   # one fused MXU matmul
                     preferred_element_type=jnp.float32)
    q_ref[...] = qkv[..., 0 * dp:1 * dp].astype(q_ref.dtype)
    k_ref[...] = qkv[..., 1 * dp:2 * dp].astype(k_ref.dtype)
    v_ref[...] = qkv[..., 2 * dp:3 * dp].astype(v_ref.dtype)


# ---------------------------------------------------------------------------
# Kernel 2: attention + final projection, keys streamed over grid axis 1.
# ---------------------------------------------------------------------------
def _attn_kernel(q_ref, k_ref, v_ref, wf_ref, o_ref, acc_scr, m_scr, l_scr, *,
                 softmax_over_batch):
    kv = pl.program_id(1)

    @pl.when(kv == 0)
    def _():
        acc_scr[...] = jnp.zeros_like(acc_scr)
        if not softmax_over_batch:               # static python branch
            m_scr[...] = jnp.full_like(m_scr, -jnp.inf)
            l_scr[...] = jnp.zeros_like(l_scr)

    q = q_ref[...]                               # (B, Tq, Dp), dk already in Wq
    k = k_ref[...]                               # (B, Tk, Dp)
    v = v_ref[...]                               # (B, Tk, Dp)

    # energy tile: '... i d , ... j d -> ... i j'
    energy = jnp.einsum('bie,bje->bij', q, k,
                        preferred_element_type=jnp.float32)

    if softmax_over_batch:
        # 3-D x quirk: nn.Softmax() normalizes over the batch axis (dim=0);
        # the normalization is complete within every key tile.
        p = jnp.exp(energy - jnp.max(energy, axis=0, keepdims=True))
        p = p / jnp.sum(p, axis=0, keepdims=True)
        acc_scr[...] += jnp.einsum('bij,bje->bie', p.astype(v.dtype), v,
                                   preferred_element_type=jnp.float32)
    else:
        # 2-D x path: softmax over keys -> online (flash-style) softmax;
        # the 1/denom is applied once to acc at the end, not to (B,Tq,Tk).
        m_prev = m_scr[...]
        m_new = jnp.maximum(m_prev, jnp.max(energy, axis=-1, keepdims=True))
        alpha = jnp.exp(m_prev - m_new)
        p = jnp.exp(energy - m_new)
        l_scr[...] = alpha * l_scr[...] + jnp.sum(p, axis=-1, keepdims=True)
        acc_scr[...] = alpha * acc_scr[...] + jnp.einsum(
            'bij,bje->bie', p.astype(v.dtype), v,
            preferred_element_type=jnp.float32)
        m_scr[...] = m_new

    @pl.when(kv == pl.num_programs(1) - 1)
    def _():
        acc = acc_scr[...]
        if not softmax_over_batch:
            acc = acc / l_scr[...]               # exact normalization
        out = jnp.einsum('bie,ef->bif', acc.astype(wf_ref.dtype), wf_ref[...],
                         preferred_element_type=jnp.float32)
        o_ref[...] = out.astype(o_ref.dtype)


# ---------------------------------------------------------------------------
# Wrapper helpers
# ---------------------------------------------------------------------------
def _sublane_granularity(dtype):
    return {4: 8, 2: 16, 1: 32}.get(jnp.dtype(dtype).itemsize, 8)


def _pick_tile(size, gran, cap=512):
    """Largest MXU-friendly tile dividing `size` (prefers 256/128 multiples)."""
    if size <= cap:
        return size
    for step in (256, 128, gran):
        if step % gran:
            continue
        t = cap - cap % step
        while t >= step:
            if size % t == 0:
                return t
            t -= step
    # TODO(synk): for awkward sequence lengths, pad S (+ -inf key masking on
    # the key-softmax path) instead of falling back to one full-S tile.
    return size


def _vmem_limit_bytes(estimate):
    try:
        cap = pltpu.get_tpu_info().vmem_capacity_bytes
    except Exception:
        cap = 64 * 1024 * 1024                   # v7x per-TC (most conservative)
    want = 2 * int(estimate) + (4 << 20)         # 2x headroom for compiler temps
    return int(max(32 << 20, min(want, cap - (8 << 20))))


# ---------------------------------------------------------------------------
# Public entry point
# ---------------------------------------------------------------------------
def multi_head_self_attention(x, wq, wk, wv, wf, num_heads, *,
                              q_tile=None, kv_tile=None, compute_dtype=None):
    """Pallas forward of MultiHeadSelfAttention.

    x: (S, D) or (B, S, D); wq/wk/wv/wf: (D, D) nn.Linear weights (out, in).
    Only mask=None is supported (the PyTorch `if mask:` raises otherwise).
    """
    orig_ndim = x.ndim
    if orig_ndim == 2:
        xb = x[None]
        softmax_over_batch = False   # 2-D energy -> nn.Softmax dim=1 (keys)
    elif orig_ndim == 3:
        xb = x
        softmax_over_batch = True    # 3-D energy -> nn.Softmax dim=0 (batch)
    else:
        raise ValueError(f"unsupported x.ndim={orig_ndim}")

    B, S, D = xb.shape
    assert D % num_heads == 0, (D, num_heads)
    head_dim = D // num_heads
    dk = float(head_dim) ** (-0.5)

    if compute_dtype is None:
        # Default = input dtype for exactness. On v5e/v6e/v7x callers can pass
        # compute_dtype=jnp.bfloat16 for native-MXU throughput (accumulation
        # stays f32); the cast happens ONCE here, never inside the kernels.
        compute_dtype = xb.dtype
    compute_dtype = jnp.dtype(compute_dtype)
    out_dtype = jnp.dtype(xb.dtype)

    # Lane-dense feature padding (zero feature padding is inert everywhere).
    d_pad = (-D) % 128
    Dp = D + d_pad

    xb_p = jnp.pad(xb, ((0, 0), (0, 0), (0, d_pad))) if d_pad else xb
    xb_p = xb_p.astype(compute_dtype)

    def _prep(w, scale=None):
        wt = w.T if scale is None else w.T * scale          # (in, out)
        if d_pad:
            wt = jnp.pad(wt, ((0, d_pad), (0, d_pad)))
        return wt.astype(compute_dtype)

    # dk folded into Wq; all weights pre-transposed / padded / pre-cast here.
    w_qkv = jnp.concatenate([_prep(wq, dk), _prep(wk), _prep(wv)], axis=1)
    wf_t = _prep(wf)

    gran = max(_sublane_granularity(compute_dtype),
               _sublane_granularity(out_dtype))
    if q_tile is None:
        q_tile = _pick_tile(S, gran)
    if kv_tile is None:
        kv_tile = _pick_tile(S, gran)
    assert S % q_tile == 0 and S % kv_tile == 0, (S, q_tile, kv_tile)
    n_q, n_kv = S // q_tile, S // kv_tile

    cs = compute_dtype.itemsize
    osz = out_dtype.itemsize

    # ---- kernel 1: fused QKV projection (sequence axis "parallel") --------
    proj_vmem = (2 * B * q_tile * Dp * cs            # x blocks (double-buffered)
                 + 2 * Dp * 3 * Dp * cs              # stacked weights
                 + 3 * 2 * B * q_tile * Dp * cs      # q/k/v out blocks
                 + B * q_tile * 3 * Dp * 4)          # f32 matmul temp
    proj_cost = pl.CostEstimate(
        flops=int(2 * B * S * Dp * 3 * Dp),
        transcendentals=0,
        bytes_accessed=int(cs * (4 * B * S * Dp + 3 * Dp * Dp)))

    q, k, v = pl.pallas_call(
        _qkv_proj_kernel,
        out_shape=tuple(jax.ShapeDtypeStruct((B, S, Dp), compute_dtype)
                        for _ in range(3)),
        grid_spec=pltpu.PrefetchScalarGridSpec(
            num_scalar_prefetch=0,
            grid=(S // q_tile,),
            in_specs=[
                pl.BlockSpec((B, q_tile, Dp), lambda i: (0, i, 0)),
                pl.BlockSpec((Dp, 3 * Dp), lambda i: (0, 0)),
            ],
            out_specs=[pl.BlockSpec((B, q_tile, Dp), lambda i: (0, i, 0))
                       for _ in range(3)],
        ),
        compiler_params=pltpu.CompilerParams(
            dimension_semantics=("parallel",),
            vmem_limit_bytes=_vmem_limit_bytes(proj_vmem)),
        cost_estimate=proj_cost,
    )(xb_p, w_qkv)

    # ---- kernel 2: attention + final projection ----------------------------
    # grid = (query tiles ["parallel" -> megacore], key tiles ["arbitrary",
    # accumulator in VMEM scratch, output written at the last key tile]).
    attn_vmem = (2 * B * q_tile * Dp * cs            # q blocks
                 + 2 * 2 * B * kv_tile * Dp * cs     # k, v blocks
                 + 2 * Dp * Dp * cs                  # wf
                 + 2 * B * q_tile * Dp * osz         # out blocks
                 + B * q_tile * Dp * 4               # acc scratch
                 + 2 * B * q_tile * kv_tile * 4      # energy / p f32 temps
                 + 2 * B * q_tile * 4)               # m, l scratch
    attn_cost = pl.CostEstimate(
        flops=int(4 * B * S * S * Dp + 2 * B * S * Dp * Dp),
        transcendentals=int(B * S * S),
        bytes_accessed=int(cs * (B * S * Dp + 2 * n_q * B * S * Dp + Dp * Dp)
                           + osz * B * S * Dp))

    out_p = pl.pallas_call(
        functools.partial(_attn_kernel, softmax_over_batch=softmax_over_batch),
        out_shape=jax.ShapeDtypeStruct((B, S, Dp), out_dtype),
        grid_spec=pltpu.PrefetchScalarGridSpec(
            num_scalar_prefetch=0,
            grid=(n_q, n_kv),
            in_specs=[
                pl.BlockSpec((B, q_tile, Dp), lambda i, j: (0, i, 0)),
                pl.BlockSpec((B, kv_tile, Dp), lambda i, j: (0, j, 0)),
                pl.BlockSpec((B, kv_tile, Dp), lambda i, j: (0, j, 0)),
                pl.BlockSpec((Dp, Dp), lambda i, j: (0, 0)),
            ],
            out_specs=pl.BlockSpec((B, q_tile, Dp), lambda i, j: (0, i, 0)),
            scratch_shapes=[
                pltpu.VMEM((B, q_tile, Dp), jnp.float32),   # output accumulator
                pltpu.VMEM((B, q_tile, 1), jnp.float32),    # running max (2-D path)
                pltpu.VMEM((B, q_tile, 1), jnp.float32),    # running denom (2-D path)
            ],
        ),
        compiler_params=pltpu.CompilerParams(
            dimension_semantics=("parallel", "arbitrary"),
            vmem_limit_bytes=_vmem_limit_bytes(attn_vmem)),
        cost_estimate=attn_cost,
    )(q, k, v, wf_t)

    out = out_p[..., :D] if d_pad else out_p
    if orig_ndim == 2:
        out = out[0]
    return out


def _reference(x, wq, wk, wv, wf, num_heads):
    """Pure-JAX transcription of the PyTorch forward (for verification)."""
    head_dim = x.shape[-1] // num_heads
    dk = float(head_dim) ** (-0.5)
    q = x @ wq.T
    k = x @ wk.T
    v = x @ wv.T
    energy = jnp.einsum('...id,...jd->...ij', q, k) * dk
    axis = 0 if energy.ndim == 3 else 1   # nn.Softmax() implicit-dim rule
    attention = jax.nn.softmax(energy, axis=axis)
    out = jnp.einsum('...ij,...jd->...id', attention, v)
    return out @ wf.T


if __name__ == "__main__":
    B, S, D, num_heads = 2, 16, 32, 4

    key = jax.random.PRNGKey(0)
    kx, kq, kk, kv_, kf = jax.random.split(key, 5)

    x = jax.random.normal(kx, (B, S, D), dtype=jnp.float32)
    # nn.Linear(dim, dim, bias=False) weights: shape (out_features, in_features)
    wq = jax.random.normal(kq, (D, D), dtype=jnp.float32) * 0.1
    wk = jax.random.normal(kk, (D, D), dtype=jnp.float32) * 0.1
    wv = jax.random.normal(kv_, (D, D), dtype=jnp.float32) * 0.1
    wf = jax.random.normal(kf, (D, D), dtype=jnp.float32) * 0.1

    # Tolerance covers TPU default-precision f32 matmuls (bf16 passes) present
    # in BOTH the kernel and the XLA reference; normalization itself is exact.
    TOL = 2e-2

    # 3-D path (nn.Softmax() implicit dim -> softmax over the batch axis).
    out = jax.block_until_ready(
        multi_head_self_attention(x, wq, wk, wv, wf, num_heads))
    ref = _reference(x, wq, wk, wv, wf, num_heads)
    assert out.shape == (B, S, D)
    err = float(jnp.max(jnp.abs(out - ref)))
    assert err < TOL, f"max err {err}"

    # 2-D path (softmax over keys).
    x2 = x[0]
    out2 = jax.block_until_ready(
        multi_head_self_attention(x2, wq, wk, wv, wf, num_heads))
    ref2 = _reference(x2, wq, wk, wv, wf, num_heads)
    assert out2.shape == (S, D)
    err2 = float(jnp.max(jnp.abs(out2 - ref2)))
    assert err2 < TOL, f"max err {err2}"

    # Exercise the streamed key-tile path explicitly (multiple q and kv tiles).
    out3 = jax.block_until_ready(
        multi_head_self_attention(x, wq, wk, wv, wf, num_heads,
                                  q_tile=8, kv_tile=8))
    err3 = float(jnp.max(jnp.abs(out3 - ref)))
    assert err3 < TOL, f"max err {err3}"

    out4 = jax.block_until_ready(
        multi_head_self_attention(x2, wq, wk, wv, wf, num_heads,
                                  q_tile=8, kv_tile=8))
    err4 = float(jnp.max(jnp.abs(out4 - ref2)))
    assert err4 < TOL, f"max err {err4}"

    print("KERNEL_OK")
</pallas_src>

<mosaic_0001>
module attributes {stable_mosaic.version = 11 : i64} {
  func.func @_qkv_proj_kernel(%arg0: i32, %arg1: memref<2x16x128xf32, #tpu.memory_space<vmem>>, %arg2: memref<128x384xf32, #tpu.memory_space<vmem>>, %arg3: memref<2x16x128xf32, #tpu.memory_space<vmem>>, %arg4: memref<2x16x128xf32, #tpu.memory_space<vmem>>, %arg5: memref<2x16x128xf32, #tpu.memory_space<vmem>>) attributes {dimension_semantics = [#tpu.dimension_semantics<parallel>], iteration_bounds = array<i64: 1>, scalar_prefetch = 0 : i64, scratch_operands = 0 : i64, tpu.core_type = #tpu.core_type<tc>, window_params = [{transform_indices = @transform_0, window_bounds = array<i64: 2, 16, 128>}, {pipeline_mode = #tpu.pipeline_mode<synchronous>, transform_indices = @transform_1, window_bounds = array<i64: 128, 384>}, {transform_indices = @transform_2, window_bounds = array<i64: 2, 16, 128>}, {transform_indices = @transform_3, window_bounds = array<i64: 2, 16, 128>}, {transform_indices = @transform_4, window_bounds = array<i64: 2, 16, 128>}]} {
    %c0 = arith.constant 0 : index
    %c0_0 = arith.constant 0 : index
    %c0_1 = arith.constant 0 : index
    %0 = vector.load %arg1[%c0, %c0_0, %c0_1] : memref<2x16x128xf32, #tpu.memory_space<vmem>>, vector<2x16x128xf32>
    %c0_2 = arith.constant 0 : index
    %c0_3 = arith.constant 0 : index
    %1 = vector.load %arg2[%c0_2, %c0_3] : memref<128x384xf32, #tpu.memory_space<vmem>>, vector<128x384xf32>
    "tpu.trace_start"() <{level = 10 : i32, message = "bsd,de->bse"}> : () -> ()
    %cst = arith.constant dense<0.000000e+00> : vector<2x16x384xf32>
    %2 = tpu.matmul %0, %1, %cst {dimension_numbers = #tpu.dot_dimension_numbers<[2], [0], [0, 1], [1], [0, 0, 0, 1, 1, 1], [], []>} : vector<2x16x128xf32>, vector<128x384xf32>, vector<2x16x384xf32> -> vector<2x16x384xf32>
    "tpu.trace_stop"() : () -> ()
    %3 = vector.extract_strided_slice %2 {offsets = [0, 0, 0], sizes = [2, 16, 128], strides = [1, 1, 1]} : vector<2x16x384xf32> to vector<2x16x128xf32>
    %c0_4 = arith.constant 0 : index
    %c0_5 = arith.constant 0 : index
    %c0_6 = arith.constant 0 : index
    %4 = vector.load %arg3[%c0_4, %c0_5, %c0_6] : memref<2x16x128xf32, #tpu.memory_space<vmem>>, vector<2x16x128xf32>
    tpu.vector_store %arg3[%c0_4, %c0_5, %c0_6], %3 {strides = array<i32>} : memref<2x16x128xf32, #tpu.memory_space<vmem>>, vector<2x16x128xf32>,
    %5 = vector.extract_strided_slice %2 {offsets = [0, 0, 128], sizes = [2, 16, 128], strides = [1, 1, 1]} : vector<2x16x384xf32> to vector<2x16x128xf32>
    %c0_7 = arith.constant 0 : index
    %c0_8 = arith.constant 0 : index
    %c0_9 = arith.constant 0 : index
    %6 = vector.load %arg4[%c0_7, %c0_8, %c0_9] : memref<2x16x128xf32, #tpu.memory_space<vmem>>, vector<2x16x128xf32>
    tpu.vector_store %arg4[%c0_7, %c0_8, %c0_9], %5 {strides = array<i32>} : memref<2x16x128xf32, #tpu.memory_space<vmem>>, vector<2x16x128xf32>,
    %7 = vector.extract_strided_slice %2 {offsets = [0, 0, 256], sizes = [2, 16, 128], strides = [1, 1, 1]} : vector<2x16x384xf32> to vector<2x16x128xf32>
    %c0_10 = arith.constant 0 : index
    %c0_11 = arith.constant 0 : index
    %c0_12 = arith.constant 0 : index
    %8 = vector.load %arg5[%c0_10, %c0_11, %c0_12] : memref<2x16x128xf32, #tpu.memory_space<vmem>>, vector<2x16x128xf32>
    tpu.vector_store %arg5[%c0_10, %c0_11, %c0_12], %7 {strides = array<i32>} : memref<2x16x128xf32, #tpu.memory_space<vmem>>, vector<2x16x128xf32>,
    return
  }
  func.func @transform_0(%arg0: i32) -> (i32, i32, i32) {
    %c0_i32 = arith.constant 0 : i32
    %c0_i32_0 = arith.constant 0 : i32
    %c0_i32_1 = arith.constant 0 : i32
    return %c0_i32, %arg0, %c0_i32_0 : i32, i32, i32
  }
  func.func @transform_1(%arg0: i32) -> (i32, i32) {
    %c0_i32 = arith.constant 0 : i32
    %c0_i32_0 = arith.constant 0 : i32
    %c0_i32_1 = arith.constant 0 : i32
    return %c0_i32, %c0_i32_0 : i32, i32
  }
  func.func @transform_2(%arg0: i32) -> (i32, i32, i32) {
    %c0_i32 = arith.constant 0 : i32
    %c0_i32_0 = arith.constant 0 : i32
    %c0_i32_1 = arith.constant 0 : i32
    return %c0_i32, %arg0, %c0_i32_0 : i32, i32, i32
  }
  func.func @transform_3(%arg0: i32) -> (i32, i32, i32) {
    %c0_i32 = arith.constant 0 : i32
    %c0_i32_0 = arith.constant 0 : i32
    %c0_i32_1 = arith.constant 0 : i32
    return %c0_i32, %arg0, %c0_i32_0 : i32, i32, i32
  }
  func.func @transform_4(%arg0: i32) -> (i32, i32, i32) {
    %c0_i32 = arith.constant 0 : i32
    %c0_i32_0 = arith.constant 0 : i32
    %c0_i32_1 = arith.constant 0 : i32
    return %c0_i32, %arg0, %c0_i32_0 : i32, i32, i32
  }
}

</mosaic_0001>

<bundles_post_ra>
// kernel: tpu_custom_call.1
= control target key start
LH: loop header
LB: loop body
LE: loop exit
PB: predicated region body
PF: predicated region fallthrough
CT: control target
= control target key end

     0   :  { %10 = vsyncpa [#allocation3], 0  ;;  %s468_s0 = inlined_call_operand.hbm [shape: f32[2,16,128], index: 0, kind: input, shape index: {}]   ;;  %s469_s1 = inlined_call_operand.hbm [shape: f32[128,384], index: 1, kind: input, shape index: {}]   ;;  %s470_s2 = inlined_call_operand.hbm [shape: f32[2,16,128], index: 2, kind: output, shape index: {0}]   ;;  %s471_s3 = inlined_call_operand.hbm [shape: f32[2,16,128], index: 3, kind: output, shape index: {1}]   ;;  %s472_s4 = inlined_call_operand.hbm [shape: f32[2,16,128], index: 4, kind: output, shape index: {2}]  }
   0x1   :  { %11 = vsyncpa [#allocation6], 0 }
   0x2   :  { %12 = vsyncpa [#allocation4], 0 }
   0x3   :  { %13 = vsyncpa [#allocation9], 0  ;;  %s18_s17 = sshll.u32 %s468_s0, 4  ;;  %s407_s18 = smov [#allocation2]   ;;  %s19_s17 = int_to_ptr.hbm [resolvable:$true] %s18_s17 }
   0x4   :  { %s20_s19 = sshll.u32 %s407_s18, 4  ;;  %s31_s22 = sshll.u32 %s469_s1, 4  ;;  %s21_s19 = int_to_ptr.vmem [resolvable:$true] %s20_s19  ;;  %s32_s22 = int_to_ptr.hbm [resolvable:$true] %s31_s22 }
   0x5   :  { %s408_s23 = smov 128   ;;  %s409_s24 = smov 8  }
   0x6   :  { %26 = dma.hbm_to_vmem [thread:$0]  %s19_s17, 512, %s21_s19, [#allocation3], %s408_s23, %s408_s23, %s409_s24  }
   0x7   :  { %s410_s25 = smov [#allocation5]   ;;  %s411_s27 = smov 384  }
   0x8   :  { %s33_s26 = sshll.u32 %s410_s25, 4  ;;  %s412_s0 = smov 24   ;;  %s34_s26 = int_to_ptr.vmem [resolvable:$true] %s33_s26 }
   0x9   :  { %39 = dma.hbm_to_vmem [thread:$0]  %s32_s22, 6144, %s34_s26, [#allocation6], %s411_s27, %s411_s27, %s412_s0  }
   0xa   :  { %399 = dma.done.wait [#allocation3], 512  }
   0xb   :  { %400 = vsyncadd [#allocation3], 4294966784 }
   0xc   :  { %401 = dma.done.wait [#allocation6], 6144  }
   0xd   :  { %402 = vsyncadd [#allocation6], 4294961152  ;;  %v99_v0 = vld [vmem:[#allocation5 + $0x178] sm:$0xff]  ;;  %v96_v1 = vld [vmem:[#allocation5 + $0x160] sm:$0xff]  ;;  %s413_s1 = smov [#allocation7]   ;;  %s205_s5 = sshll.u32 %s470_s2, 4  ;;  %s206_s5 = int_to_ptr.hbm [resolvable:$true] %s205_s5 }
   0xe   :  { %158 = vmatpush.msra.mxu2 %v99_v0  ;;  %v98_v2 = vld [vmem:[#allocation5 + $0x170] sm:$0xff]  ;;  %v95_v3 = vld [vmem:[#allocation5 + $0x158] sm:$0xff]  ;;  %v93_v4 = vld [vmem:[#allocation5 + $0x148] sm:$0xff]  ;;  %s203_s28 = sshll.u32 %s413_s1, 4  ;;  %s414_s6 = smov [#allocation8]   ;;  %s204_s28 = int_to_ptr.vmem [resolvable:$true] %s203_s28 }
   0xf   :  { %129 = vmatpush.msra.mxu1 %v98_v2  ;;  %v97_v5 = vld [vmem:[#allocation5 + $0x168] sm:$0xff]  ;;  %v92_v6 = vld [vmem:[#allocation5 + $0x140] sm:$0xff]  ;;  %v94_v7 = vld [vmem:[#allocation5 + $0x150] sm:$0xff]  ;;  %s216_s7 = sshll.u32 %s414_s6, 4  ;;  %s218_s10 = sshll.u32 %s471_s3, 4  ;;  %s217_s7 = int_to_ptr.vmem [resolvable:$true] %s216_s7  ;;  %s219_s10 = int_to_ptr.hbm [resolvable:$true] %s218_s10 }
  0x10   :  { %159 = vmatpush.msra.mxu2 %v96_v1  ;;  %254 = vmatpush.msra.mxu3 %v97_v5  ;;  %v90_v8 = vld [vmem:[#allocation5 + $0x130] sm:$0xff]  ;;  %v91_v9 = vld [vmem:[#allocation5 + $0x138] sm:$0xff]  ;;  %v89_v10 = vld [vmem:[#allocation5 + $0x128] sm:$0xff]  ;;  %s415_s11 = smov [#allocation10]   ;;  %s231_s2 = sshll.u32 %s472_s4, 4  ;;  %s232_s2 = int_to_ptr.hbm [resolvable:$true] %s231_s2 }
  0x11   :  { %130 = vmatpush.msra.mxu1 %v95_v3  ;;  %100 = vmatpush.msra.mxu0 %v97_v5  ;;  %v87_v11 = vld [vmem:[#allocation5 + $0x118] sm:$0xff]  ;;  %v88_v12 = vld [vmem:[#allocation5 + $0x120] sm:$0xff]  ;;  %v86_v13 = vld [vmem:[#allocation5 + $0x110] sm:$0xff]  ;;  %s229_s12 = sshll.u32 %s415_s11, 4  ;;  %s230_s12 = int_to_ptr.vmem [resolvable:$true] %s229_s12 }
  0x12   :  { %160 = vmatpush.msra.mxu2 %v93_v4  ;;  %255 = vmatpush.msra.mxu3 %v94_v7  ;;  %v84_v14 = vld [vmem:[#allocation5 + $0x100] sm:$0xff]  ;;  %v85_v15 = vld [vmem:[#allocation5 + $0x108] sm:$0xff]  ;;  %v83_v16 = vld [vmem:[#allocation5 + $0xf8] sm:$0xff] }
  0x13   :  { %131 = vmatpush.msra.mxu1 %v92_v6  ;;  %101 = vmatpush.msra.mxu0 %v94_v7  ;;  %v81_v17 = vld [vmem:[#allocation5 + $0xe8] sm:$0xff]  ;;  %v82_v18 = vld [vmem:[#allocation5 + $0xf0] sm:$0xff]  ;;  %v80_v19 = vld [vmem:[#allocation5 + $0xe0] sm:$0xff] }
  0x14   :  { %161 = vmatpush.msra.mxu2 %v90_v8  ;;  %256 = vmatpush.msra.mxu3 %v91_v9  ;;  %v78_v20 = vld [vmem:[#allocation5 + $0xd0] sm:$0xff]  ;;  %v79_v21 = vld [vmem:[#allocation5 + $0xd8] sm:$0xff]  ;;  %v77_v22 = vld [vmem:[#allocation5 + $0xc8] sm:$0xff] }
  0x15   :  { %132 = vmatpush.msra.mxu1 %v89_v10  ;;  %102 = vmatpush.msra.mxu0 %v91_v9  ;;  %v75_v23 = vld [vmem:[#allocation5 + $0xb8] sm:$0xff]  ;;  %v76_v24 = vld [vmem:[#allocation5 + $0xc0] sm:$0xff]  ;;  %v74_v25 = vld [vmem:[#allocation5 + $0xb0] sm:$0xff] }
  0x16   :  { %162 = vmatpush.msra.mxu2 %v87_v11  ;;  %257 = vmatpush.msra.mxu3 %v88_v12  ;;  %v72_v26 = vld [vmem:[#allocation5 + $0xa0] sm:$0xff]  ;;  %v73_v27 = vld [vmem:[#allocation5 + $0xa8] sm:$0xff]  ;;  %v71_v28 = vld [vmem:[#allocation5 + $0x98] sm:$0xff] }
  0x17   :  { %133 = vmatpush.msra.mxu1 %v86_v13  ;;  %103 = vmatpush.msra.mxu0 %v88_v12  ;;  %v69_v29 = vld [vmem:[#allocation5 + $0x88] sm:$0xff]  ;;  %v70_v30 = vld [vmem:[#allocation5 + $0x90] sm:$0xff]  ;;  %v68_v31 = vld [vmem:[#allocation5 + $0x80] sm:$0xff] }
  0x18   :  { %163 = vmatpush.msra.mxu2 %v84_v14  ;;  %258 = vmatpush.msra.mxu3 %v85_v15  ;;  %v66_v32 = vld [vmem:[#allocation5 + $0x70] sm:$0xff]  ;;  %v67_v33 = vld [vmem:[#allocation5 + $0x78] sm:$0xff]  ;;  %v65_v34 = vld [vmem:[#allocation5 + $0x68] sm:$0xff] }
  0x19   :  { %134 = vmatpush.msra.mxu1 %v83_v16  ;;  %104 = vmatpush.msra.mxu0 %v85_v15  ;;  %v63_v35 = vld [vmem:[#allocation5 + $0x58] sm:$0xff]  ;;  %v64_v36 = vld [vmem:[#allocation5 + $0x60] sm:$0xff]  ;;  %v62_v37 = vld [vmem:[#allocation5 + $0x50] sm:$0xff] }
  0x1a   :  { %164 = vmatpush.msra.mxu2 %v81_v17  ;;  %259 = vmatpush.msra.mxu3 %v82_v18  ;;  %v60_v38 = vld [vmem:[#allocation5 + $0x40] sm:$0xff]  ;;  %v61_v39 = vld [vmem:[#allocation5 + $0x48] sm:$0xff]  ;;  %v59_v40 = vld [vmem:[#allocation5 + $0x38] sm:$0xff] }
  0x1b   :  { %135 = vmatpush.msra.mxu1 %v80_v19  ;;  %105 = vmatpush.msra.mxu0 %v82_v18  ;;  %v57_v41 = vld [vmem:[#allocation5 + $0x28] sm:$0xff]  ;;  %v58_v42 = vld [vmem:[#allocation5 + $0x30] sm:$0xff]  ;;  %v56_v43 = vld [vmem:[#allocation5 + $0x20] sm:$0xff] }
  0x1c   :  { %165 = vmatpush.msra.mxu2 %v78_v20  ;;  %260 = vmatpush.msra.mxu3 %v79_v21  ;;  %v54_v44 = vld [vmem:[#allocation5 + $0x10] sm:$0xff]  ;;  %v55_v45 = vld [vmem:[#allocation5 + $0x18] sm:$0xff]  ;;  %v48_v46 = vld [vmem:[#allocation2] sm:$0xff] }
  0x1d   :  { %136 = vmatpush.msra.mxu1 %v77_v22  ;;  %106 = vmatpush.msra.mxu0 %v79_v21  ;;  %v53_v47 = vld [vmem:[#allocation5 + $0x8] sm:$0xff]  ;;  %v52_v48 = vld [vmem:[#allocation5] sm:$0xff]  ;;  %v50_v50 = vld [vmem:[#allocation2 + $0x10] sm:$0xff] }
  0x1e   :  { %166 = vmatpush.msra.mxu2 %v75_v23  ;;  %261 = vmatpush.msra.mxu3 %v76_v24  ;;  %v49_v49 = vld [vmem:[#allocation2 + $0x8] sm:$0xff]  ;;  %v51_v51 = vld [vmem:[#allocation2 + $0x18] sm:$0xff] }
  0x1f   :  { %137 = vmatpush.msra.mxu1 %v74_v25  ;;  %107 = vmatpush.msra.mxu0 %v76_v24 }
  0x20   :  { %167 = vmatpush.msra.mxu2 %v72_v26  ;;  %262 = vmatpush.msra.mxu3 %v73_v27 }
  0x21   :  { %138 = vmatpush.msra.mxu1 %v71_v28  ;;  %108 = vmatpush.msra.mxu0 %v73_v27 }
  0x22   :  { %168 = vmatpush.msra.mxu2 %v69_v29  ;;  %263 = vmatpush.msra.mxu3 %v70_v30 }
  0x23   :  { %139 = vmatpush.msra.mxu1 %v68_v31  ;;  %109 = vmatpush.msra.mxu0 %v70_v30 }
  0x24   :  { %169 = vmatpush.msra.mxu2 %v66_v32  ;;  %264 = vmatpush.msra.mxu3 %v67_v33 }
  0x25   :  { %140 = vmatpush.msra.mxu1 %v65_v34  ;;  %110 = vmatpush.msra.mxu0 %v67_v33 }
  0x26   :  { %170 = vmatpush.msra.mxu2 %v63_v35  ;;  %265 = vmatpush.msra.mxu3 %v64_v36 }
  0x27   :  { %141 = vmatpush.msra.mxu1 %v62_v37  ;;  %111 = vmatpush.msra.mxu0 %v64_v36 }
  0x28   :  { %171 = vmatpush.msra.mxu2 %v60_v38  ;;  %266 = vmatpush.msra.mxu3 %v61_v39 }
  0x29   :  { %142 = vmatpush.msra.mxu1 %v59_v40  ;;  %112 = vmatpush.msra.mxu0 %v61_v39 }
  0x2a   :  { %172 = vmatpush.msra.mxu2 %v57_v41  ;;  %267 = vmatpush.msra.mxu3 %v58_v42 }
  0x2b   :  { %143 = vmatpush.msra.mxu1 %v56_v43  ;;  %113 = vmatpush.msra.mxu0 %v58_v42 }
  0x2c   :  { %173 = vmatpush.msra.mxu2 %v54_v44  ;;  %268 = vmatpush.msra.mxu3 %v55_v45 }
  0x2d   :  { %174 = vmatmul.f32.vlgmr.msra.gmra.mxu2 %v48_v46  ;;  %144 = vmatpush.msra.mxu1 %v53_v47 }
  0x2e   :  { %145 = vmatmul.f32.vlgmr.msra.gmra.mxu1 %v48_v46  ;;  %269 = vmatpush.msra.mxu3 %v52_v48 }
  0x2f   :  { %119 = vmatmul.f32.vlgmr.msra.gmra.mxu3 %v49_v49  ;;  %114 = vmatpush.msra.mxu0 %v55_v45 }
  0x31   :  { %115 = vmatpush.msra.mxu0 %v52_v48 }
  0x32   :  { %116 = vmatmul.f32.vlgmr.msra.gmra.mxu0 %v48_v46 }
  0x35   :  { %177 = vmatmul.f32.gmra.mxu2 %v49_v49 }
  0x36   :  { %148 = vmatmul.f32.gmra.mxu1 %v49_v49 }
  0x37   :  { %122 = vmatmul.f32.gmra.mxu3 %v50_v50 }
  0x3d   :  { %180 = vmatmul.f32.gmra.mxu2 %v50_v50 }
  0x3e   :  { %151 = vmatmul.f32.gmra.mxu1 %v50_v50 }
  0x3f   :  { %125 = vmatmul.f32.gmra.mxu3 %v51_v51 }
  0x45   :  { %183 = vmatmul.f32.gmra.mxu2 %v51_v51 }
  0x46   :  { %154 = vmatmul.f32.gmra.mxu1 %v51_v51 }
  0xab   :  { %v146_v52 = vpop.f32.mrf.mxu1 }
  0xac   :  { %191 = vst [vmem:[#allocation8] sm:$0xff] %v146_v52 }
  0xaf   :  { %v117_v53 = vpop.f32.mrf.mxu0 }
  0xb0   :  { %v175_v54 = vpop.f32.mrf.mxu2  ;;  %187 = vst [vmem:[#allocation7] sm:$0xff] %v117_v53 }
  0xb1   :  { %195 = vst [vmem:[#allocation10] sm:$0xff] %v175_v54 }
  0xb2   :  { %v120_v55 = vpop.f32.mrf.mxu3 }
  0xb3   :  { %v149_v56 = vpop.f32.mrf.mxu1  ;;  %188 = vst [vmem:[#allocation7 + $0x8] sm:$0xff] %v120_v55 }
  0xb4   :  { %192 = vst [vmem:[#allocation8 + $0x8] sm:$0xff] %v149_v56 }
  0xb8   :  { %v178_v57 = vpop.f32.mrf.mxu2 }
  0xb9   :  { %196 = vst [vmem:[#allocation10 + $0x8] sm:$0xff] %v178_v57 }
  0xba   :  { %v123_v58 = vpop.f32.mrf.mxu3 }
  0xbb   :  { %v152_v59 = vpop.f32.mrf.mxu1  ;;  %189 = vst [vmem:[#allocation7 + $0x10] sm:$0xff] %v123_v58 }
  0xbc   :  { %193 = vst [vmem:[#allocation8 + $0x10] sm:$0xff] %v152_v59 }
  0xc0   :  { %v181_v60 = vpop.f32.mrf.mxu2 }
  0xc1   :  { %197 = vst [vmem:[#allocation10 + $0x10] sm:$0xff] %v181_v60 }
  0xc2   :  { %v126_v61 = vpop.f32.mrf.mxu3 }
  0xc3   :  { %v155_v62 = vpop.f32.mrf.mxu1  ;;  %190 = vst [vmem:[#allocation7 + $0x18] sm:$0xff] %v126_v61 }
  0xc4   :  { %194 = vst [vmem:[#allocation8 + $0x18] sm:$0xff] %v155_v62  ;;  %211 = dma.vmem_to_hbm [thread:$0]  %s204_s28, 512, %s206_s5, [#allocation4], %s408_s23, %s408_s23, %s409_s24  }
  0xc5   :  { %224 = dma.vmem_to_hbm [thread:$0]  %s217_s7, 512, %s219_s10, [#allocation9], %s408_s23, %s408_s23, %s409_s24  }
  0xc8   :  { %v184_v63 = vpop.f32.mrf.mxu2 }
  0xc9   :  { %198 = vst [vmem:[#allocation10 + $0x18] sm:$0xff] %v184_v63 }
  0xca   :  { %237 = dma.vmem_to_hbm [thread:$0]  %s230_s12, 512, %s232_s2, [#allocation9], %s408_s23, %s408_s23, %s409_s24  }
  0xcb   :  { %403 = dma.done.wait [#allocation4], 512  }
  0xcc   :  { %404 = vsyncadd [#allocation4], 4294966784 }
  0xcd   :  { %405 = dma.done.wait [#allocation9], 1024  }
  0xce   :  { %406 = vsyncadd [#allocation9], 4294966272 }
  0xcf   :  { %250 = vsyncpa [#allocation3], 1 }
  0xd0   :  { %251 = vsyncpa [#allocation6], 1 }
  0xd1   :  { %252 = vsyncpa [#allocation4], 1 }
  0xd2   :  { %253 = vsyncpa [#allocation9], 1 }

</bundles_post_ra>
